<compile_context>
chip_gen: v7x
topology: tpu7x:2x2x1
jax: 0.10.0
libtpu: 0.0.40
codegen_flags: <defaults>
</compile_context>

<pallas_src>
import jax
import jax.numpy as jnp
from jax.experimental import pallas as pl
from jax.experimental.pallas import tpu as pltpu

_LANES = 128
_TILE_ROWS_MAX = 2048     # 2048 x 128 x 4 B = 1 MiB per f32 buffer
_MIN_GRID_STEPS = 4       # pipelining overlap + v7x megacore sharding


def _round_up(n, m):
    return -(-n // m) * m


def _mlp_kernel(params_ref, x_ref, o_ref):
    # params_ref: SMEM (10,) f32 = [w1_0..2, b1_0..2, w2_0..2, b2]
    # x_ref/o_ref: VMEM (tile_rows, 128), caller dtype
    x = x_ref[...].astype(jnp.float32)
    # Unrolled hidden dim (3): full-width FMA (VPU) + tanh (EUP), no XLU reduce.
    acc = params_ref[9] + params_ref[6] * jnp.tanh(params_ref[0] * x + params_ref[3])
    acc = acc + params_ref[7] * jnp.tanh(params_ref[1] * x + params_ref[4])
    acc = acc + params_ref[8] * jnp.tanh(params_ref[2] * x + params_ref[5])
    o_ref[...] = acc.astype(o_ref.dtype)


def universal_approximation(x, w1, b1, w2, b2):
    """Forward pass of UniversalApproximation.

    x:  (N, 1)   input (feature dim last)
    w1: (1, 3)   hidden weight, [in_features, out_features] layout
                 (NOTE: transposed vs torch.nn.Linear.weight which is (out,in))
    b1: (3,)     hidden bias
    w2: (3, 1)   output weight, [in_features, out_features] layout
    b2: (1,)     output bias
    Returns (N, 1) in x.dtype.
    """
    N = x.shape[0]
    dtype = x.dtype
    itemsize = x.dtype.itemsize
    # Sublane packing granule: 8 rows for f32, 16 for bf16, 32 for 1-byte types.
    sub = max(8, 32 // itemsize)

    # Pack the 10 scalars into one SMEM-resident f32 vector.
    params = jnp.concatenate([
        w1.reshape(3).astype(jnp.float32),   # w1_0, w1_1, w1_2
        b1.reshape(3).astype(jnp.float32),   # b1_0, b1_1, b1_2
        w2.reshape(3).astype(jnp.float32),   # w2_0, w2_1, w2_2
        b2.reshape(1).astype(jnp.float32),   # b2
    ])

    # Lane-dense relayout: (N, 1) -> (rows_slab, 128), padded only to the
    # sublane granule (NOT to a tile multiple).
    rows = pl.cdiv(N, _LANES)
    rows_slab = _round_up(rows, sub)
    # >= _MIN_GRID_STEPS grid steps when rows permit, capped at _TILE_ROWS_MAX.
    tile_rows = min(_TILE_ROWS_MAX,
                    max(sub, _round_up(pl.cdiv(rows, _MIN_GRID_STEPS), sub)))
    grid = (pl.cdiv(rows_slab, tile_rows),)

    pad = rows_slab * _LANES - N
    x_flat = x.reshape(-1)
    if pad:                         # free (elided) when N is slab-aligned
        x_flat = jnp.pad(x_flat, (0, pad))
    x_slab = x_flat.reshape(rows_slab, _LANES)

    out_slab = pl.pallas_call(
        _mlp_kernel,
        out_shape=jax.ShapeDtypeStruct((rows_slab, _LANES), dtype),
        grid=grid,
        in_specs=[
            pl.BlockSpec(memory_space=pltpu.SMEM),                  # params
            pl.BlockSpec((tile_rows, _LANES), lambda i: (i, 0)),    # x slab
        ],
        out_specs=pl.BlockSpec((tile_rows, _LANES), lambda i: (i, 0)),
        compiler_params=pltpu.CompilerParams(
            dimension_semantics=("parallel",)),
        cost_estimate=pl.CostEstimate(
            flops=12 * N,
            transcendentals=3 * N,
            bytes_accessed=2 * N * itemsize + 10 * 4),
    )(params, x_slab)

    # Pad lanes hold w2·tanh(b1)+b2 garbage -> sliced away, never reduced.
    out_flat = out_slab.reshape(-1)
    if pad:                         # no-op when N is slab-aligned
        out_flat = out_flat[:N]
    return out_flat.reshape(N, 1)


def _reference(x, w1, b1, w2, b2):
    return jnp.tanh(x @ w1 + b1) @ w2 + b2


if __name__ == "__main__":
    key = jax.random.PRNGKey(0)
    k_x, k_w1, k_b1, k_w2, k_b2, k_x2, k_x3 = jax.random.split(key, 7)

    # Deterministic parameter init (PyTorch Linear-style uniform bounds).
    # hidden: Linear(1, 3) -> bound = 1/sqrt(1) = 1
    w1 = jax.random.uniform(k_w1, (1, 3), minval=-1.0, maxval=1.0, dtype=jnp.float32)
    b1 = jax.random.uniform(k_b1, (3,), minval=-1.0, maxval=1.0, dtype=jnp.float32)
    # output: Linear(3, 1) -> bound = 1/sqrt(3)
    bound = 1.0 / jnp.sqrt(3.0)
    w2 = jax.random.uniform(k_w2, (3, 1), minval=-bound, maxval=bound, dtype=jnp.float32)
    b2 = jax.random.uniform(k_b2, (1,), minval=-bound, maxval=bound, dtype=jnp.float32)

    # Small primary test (N = 8).
    N = 8
    x = jax.random.normal(k_x, (N, 1), dtype=jnp.float32)
    out = jax.block_until_ready(universal_approximation(x, w1, b1, w2, b2))
    ref = _reference(x, w1, b1, w2, b2)
    assert out.shape == (N, 1)
    assert jnp.allclose(out, ref, atol=1e-5), (out, ref)

    # Exercises the pad / lane-dense relayout path (N not a multiple of 128).
    N2 = 1000
    x2 = jax.random.normal(k_x2, (N2, 1), dtype=jnp.float32)
    out2 = jax.block_until_ready(universal_approximation(x2, w1, b1, w2, b2))
    ref2 = _reference(x2, w1, b1, w2, b2)
    assert out2.shape == (N2, 1)
    assert jnp.allclose(out2, ref2, atol=1e-5)

    # Slab-aligned fast path (zero pad, multi-step grid: rows=32, 4 steps).
    N3 = 4096
    x3 = jax.random.normal(k_x3, (N3, 1), dtype=jnp.float32)
    out3 = jax.block_until_ready(universal_approximation(x3, w1, b1, w2, b2))
    ref3 = _reference(x3, w1, b1, w2, b2)
    assert out3.shape == (N3, 1)
    assert jnp.allclose(out3, ref3, atol=1e-5)

    print("KERNEL_OK")
</pallas_src>

<mosaic_0001>
module attributes {stable_mosaic.version = 11 : i64} {
  func.func @_mlp_kernel(%arg0: i32, %arg1: memref<10xf32, #tpu.memory_space<smem>>, %arg2: memref<8x128xf32, #tpu.memory_space<vmem>>, %arg3: memref<8x128xf32, #tpu.memory_space<vmem>>) attributes {dimension_semantics = [#tpu.dimension_semantics<parallel>], iteration_bounds = array<i64: 1>, scalar_prefetch = 0 : i64, scratch_operands = 0 : i64, tpu.core_type = #tpu.core_type<tc>, window_params = [{transform_indices = @transform_0, window_bounds = array<i64: 10>}, {transform_indices = @transform_1, window_bounds = array<i64: 8, 128>}, {transform_indices = @transform_2, window_bounds = array<i64: 8, 128>}]} {
    %c0 = arith.constant 0 : index
    %c0_0 = arith.constant 0 : index
    %0 = vector.load %arg2[%c0, %c0_0] : memref<8x128xf32, #tpu.memory_space<vmem>>, vector<8x128xf32>
    %c9 = arith.constant 9 : index
    %1 = memref.load %arg1[%c9] : memref<10xf32, #tpu.memory_space<smem>>
    %c6 = arith.constant 6 : index
    %2 = memref.load %arg1[%c6] : memref<10xf32, #tpu.memory_space<smem>>
    %c0_1 = arith.constant 0 : index
    %3 = memref.load %arg1[%c0_1] : memref<10xf32, #tpu.memory_space<smem>>
    %4 = vector.broadcast %3 : f32 to vector<8x128xf32>
    %5 = arith.mulf %4, %0 : vector<8x128xf32>
    %c3 = arith.constant 3 : index
    %6 = memref.load %arg1[%c3] : memref<10xf32, #tpu.memory_space<smem>>
    %7 = vector.broadcast %6 : f32 to vector<8x128xf32>
    %8 = arith.addf %5, %7 : vector<8x128xf32>
    %9 = math.tanh %8 : vector<8x128xf32>
    %10 = vector.broadcast %2 : f32 to vector<8x128xf32>
    %11 = arith.mulf %10, %9 : vector<8x128xf32>
    %12 = vector.broadcast %1 : f32 to vector<8x128xf32>
    %13 = arith.addf %12, %11 : vector<8x128xf32>
    %c7 = arith.constant 7 : index
    %14 = memref.load %arg1[%c7] : memref<10xf32, #tpu.memory_space<smem>>
    %c1 = arith.constant 1 : index
    %15 = memref.load %arg1[%c1] : memref<10xf32, #tpu.memory_space<smem>>
    %16 = vector.broadcast %15 : f32 to vector<8x128xf32>
    %17 = arith.mulf %16, %0 : vector<8x128xf32>
    %c4 = arith.constant 4 : index
    %18 = memref.load %arg1[%c4] : memref<10xf32, #tpu.memory_space<smem>>
    %19 = vector.broadcast %18 : f32 to vector<8x128xf32>
    %20 = arith.addf %17, %19 : vector<8x128xf32>
    %21 = math.tanh %20 : vector<8x128xf32>
    %22 = vector.broadcast %14 : f32 to vector<8x128xf32>
    %23 = arith.mulf %22, %21 : vector<8x128xf32>
    %24 = arith.addf %13, %23 : vector<8x128xf32>
    %c8 = arith.constant 8 : index
    %25 = memref.load %arg1[%c8] : memref<10xf32, #tpu.memory_space<smem>>
    %c2 = arith.constant 2 : index
    %26 = memref.load %arg1[%c2] : memref<10xf32, #tpu.memory_space<smem>>
    %27 = vector.broadcast %26 : f32 to vector<8x128xf32>
    %28 = arith.mulf %27, %0 : vector<8x128xf32>
    %c5 = arith.constant 5 : index
    %29 = memref.load %arg1[%c5] : memref<10xf32, #tpu.memory_space<smem>>
    %30 = vector.broadcast %29 : f32 to vector<8x128xf32>
    %31 = arith.addf %28, %30 : vector<8x128xf32>
    %32 = math.tanh %31 : vector<8x128xf32>
    %33 = vector.broadcast %25 : f32 to vector<8x128xf32>
    %34 = arith.mulf %33, %32 : vector<8x128xf32>
    %35 = arith.addf %24, %34 : vector<8x128xf32>
    %c0_2 = arith.constant 0 : index
    %c0_3 = arith.constant 0 : index
    %36 = vector.load %arg3[%c0_2, %c0_3] : memref<8x128xf32, #tpu.memory_space<vmem>>, vector<8x128xf32>
    tpu.vector_store %arg3[%c0_2, %c0_3], %35 {strides = array<i32>} : memref<8x128xf32, #tpu.memory_space<vmem>>, vector<8x128xf32>,
    return
  }
  func.func @transform_0(%arg0: i32) -> i32 {
    %c0_i32 = arith.constant 0 : i32
    %c0_i32_0 = arith.constant 0 : i32
    return %c0_i32 : i32
  }
  func.func @transform_1(%arg0: i32) -> (i32, i32) {
    %c0_i32 = arith.constant 0 : i32
    %c0_i32_0 = arith.constant 0 : i32
    return %arg0, %c0_i32 : i32, i32
  }
  func.func @transform_2(%arg0: i32) -> (i32, i32) {
    %c0_i32 = arith.constant 0 : i32
    %c0_i32_0 = arith.constant 0 : i32
    return %arg0, %c0_i32 : i32, i32
  }
}

</mosaic_0001>

<bundles_post_ra>
// kernel: tpu_custom_call.1
= control target key start
LH: loop header
LB: loop body
LE: loop exit
PB: predicated region body
PF: predicated region fallthrough
CT: control target
= control target key end

     0   :  { %7 = vsyncpa [#allocation5], 0  ;;  %s220_s0 = inlined_call_operand.hbm [shape: f32[10], index: 0, kind: input, shape index: {}]   ;;  %s221_s1 = inlined_call_operand.hbm [shape: f32[8,128], index: 1, kind: input, shape index: {}]   ;;  %s222_s2 = inlined_call_operand.hbm [shape: f32[8,128], index: 2, kind: output, shape index: {}]  }
   0x1   :  { %8 = vsyncpa [#allocation3], 0 }
   0x2   :  { %9 = vsyncpa [#allocation4], 0  ;;  %s106_s11 = scalar_lea.hbm %s220_s0, 16 }
   0x3   :  { %p107_p0 = scmp.ne.s32.totalorder %s220_s0, %s106_s11  ;;  %p110_p1 = scmp.lt.u32.totalorder %s106_s11, %s220_s0 }
   0x5   :  { %p112_p2 = pnand %p110_p1, %p107_p0 }
   0x7   :  { %115 = shalt.err (!%p112_p2)
}
   0x8   :  { %s166_s16 = smov [#allocation2]   ;;  %s167_s19 = smov [#allocation6]  }
   0x9   :  { %17 = dma.hbm_to_smem %s220_s0, 16, %s166_s16, [#allocation5]  }
   0xa   :  { %s24_s20 = sshll.u32 %s167_s19, 4  ;;  %s116_s23 = scalar_lea.hbm %s221_s1, 128  ;;  %s25_s20 = int_to_ptr.vmem [resolvable:$true] %s24_s20 }
   0xb   :  { %p117_p3 = scmp.ne.s32.totalorder %s221_s1, %s116_s23  ;;  %p120_p4 = scmp.lt.u32.totalorder %s116_s23, %s221_s1 }
   0xd   :  { %p122_p5 = pnand %p120_p4, %p117_p3 }
   0xf   :  { %125 = shalt.err (!%p122_p5)
}
  0x10   :  { %s126_s28 = scalar_lea.vmem %s25_s20, 128  ;;  %p131_p7 = scmp.lt.s32.totalorder %s25_s20, %s25_s20 }
  0x11   :  { %p127_p6 = scmp.ne.s32.totalorder %s25_s20, %s126_s28  ;;  %p132_p8 = scmp.lt.s32.totalorder %s126_s28, %s126_s28 }
  0x13   :  { %p133_p9 = por %p132_p8, %p131_p7 }
  0x15   :  { %p134_p10 = pnand %p133_p9, %p127_p6 }
  0x17   :  { %137 = shalt.err (!%p134_p10)
}
  0x18   :  { %27 = dma.hbm_to_vmem [thread:$0]  %s221_s1, 128, %s25_s20, [#allocation3]  }
  0x19   :  { %160 = dma.done.wait [#allocation5], 16  }
  0x1a   :  { %161 = vsyncadd [#allocation5], 4294967280 }
  0x1b   :  { %162 = dma.done.wait [#allocation3], 128  }
  0x1c   :  { %163 = vsyncadd [#allocation3], 4294967168 }
  0x1d   :  { %34 = sfence }
  0x1e   :  { %s38_s30 = sld [smem:[#allocation2]]  ;;  %s90_s3 = sld [smem:[#allocation2 + $0x3]]  ;;  %v35_v0 = vld [vmem:[#allocation6] sm:$0xff] }
  0x1f   :  { %s92_s4 = sld [smem:[#allocation2 + $0x1]]  ;;  %s93_s5 = sld [smem:[#allocation2 + $0x4]] }
  0x20   :  { %s95_s6 = sld [smem:[#allocation2 + $0x2]]  ;;  %s96_s7 = sld [smem:[#allocation2 + $0x5]] }
  0x21   :  { %s89_s1 = sld [smem:[#allocation2 + $0x6]]  ;;  %s91_s8 = sld [smem:[#allocation2 + $0x7]] }
  0x22   :  { %s88_s9 = sld [smem:[#allocation2 + $0x9]]  ;;  %s94_s10 = sld [smem:[#allocation2 + $0x8]] }
  0x23   :  { %s168_s11 = smov [#allocation7]  }
  0x24   :  { %v39_v1 = vstv %s38_s30  ;;  %v42_v2 = vstv %s90_s3  ;;  %s78_s12 = sshll.u32 %s168_s11, 4  ;;  %s79_s12 = int_to_ptr.vmem [resolvable:$true] %s78_s12 }
  0x25   :  { %v40_v3 = vmul.f32 %v39_v1, %v35_v0  ;;  %v51_v4 = vstv %s92_s4  ;;  %v54_v6 = vstv %s93_s5  ;;  %s138_s13 = scalar_lea.vmem %s79_s12, 128  ;;  %p143_p12 = scmp.lt.s32.totalorder %s79_s12, %s79_s12 }
  0x26   :  { %v52_v5 = vmul.f32 %v51_v4, %v35_v0  ;;  %v62_v8 = vstv %s95_s6  ;;  %v65_v9 = vstv %s96_s7  ;;  %p139_p11 = scmp.ne.s32.totalorder %s79_s12, %s138_s13  ;;  %p144_p13 = scmp.lt.s32.totalorder %s138_s13, %s138_s13 }
  0x27   :  { %v43_v7 = vadd.f32 %v42_v2, %v40_v3  ;;  %v63_v11 = vmul.f32 %v62_v8, %v35_v0  ;;  %v45_v13 = vstv %s89_s1  ;;  %v57_v14 = vstv %s91_s8 }
  0x28   :  { %v55_v10 = vadd.f32 %v54_v6, %v52_v5  ;;  %v47_v16 = vstv %s88_s9  ;;  %v68_v19 = vstv %s94_s10  ;;  %p145_p0 = por %p144_p13, %p143_p12 }
  0x29   :  { %100 = vtanh.f32 %v43_v7  ;;  %v66_v12 = vadd.f32 %v65_v9, %v63_v11 }
  0x2a   :  { %102 = vtanh.f32 %v55_v10  ;;  %p146_p1 = pnand %p145_p0, %p139_p11 }
  0x2b   :  { %104 = vtanh.f32 %v66_v12 }
  0x33   :  { %v101_v15 = vpop.eup %100 }
  0x34   :  { %v103_v17 = vpop.eup %102  ;;  %v46_v18 = vmul.f32 %v101_v15, %v45_v13 }
  0x35   :  { %v58_v20 = vmul.f32 %v103_v17, %v57_v14  ;;  %v105_v21 = vpop.eup %104 }
  0x36   :  { %v48_v22 = vadd.f32 %v47_v16, %v46_v18  ;;  %v69_v23 = vmul.f32 %v105_v21, %v68_v19 }
  0x38   :  { %v59_v24 = vadd.f32 %v58_v20, %v48_v22 }
  0x3a   :  { %v70_v25 = vadd.f32 %v69_v23, %v59_v24 }
  0x3c   :  { %71 = vst [vmem:[#allocation7] sm:$0xff] %v70_v25 }
  0x3d   :  { %149 = shalt.err (!%p146_p1)
}
  0x3e   :  { %s150_s16 = scalar_lea.hbm %s222_s2, 128 }
  0x3f   :  { %p151_p2 = scmp.ne.s32.totalorder %s222_s2, %s150_s16  ;;  %p154_p3 = scmp.lt.u32.totalorder %s150_s16, %s222_s2 }
  0x41   :  { %p156_p4 = pnand %p154_p3, %p151_p2 }
  0x43   :  { %159 = shalt.err (!%p156_p4)
}
  0x44   :  { %81 = dma.vmem_to_hbm [thread:$0]  %s79_s12, 128, %s222_s2, [#allocation4]  }
  0x45   :  { %164 = dma.done.wait [#allocation4], 128  }
  0x46   :  { %165 = vsyncadd [#allocation4], 4294967168 }
  0x47   :  { %85 = vsyncpa [#allocation3], 1 }
  0x48   :  { %86 = vsyncpa [#allocation4], 1 }
  0x49   :  { %87 = vsyncpa [#allocation5], 1 }

</bundles_post_ra>
